<compile_context>
chip_gen: v7x
topology: tpu7x:2x2x1
jax: 0.10.0
libtpu: 0.0.40
codegen_flags: <defaults>
</compile_context>

<pallas_src>
import numpy as np
import jax
import jax.numpy as jnp
from jax.experimental import pallas as pl
from jax.experimental.pallas import tpu as pltpu


# ----------------------------- budgets -------------------------------------

_VMEM_LIMIT_BYTES = 32 * 1024 * 1024   # requested scoped VMEM; safe on v5e..v7x
_VMEM_WORK_BUDGET = 20 * 1024 * 1024   # target working set incl. double buffering
_K3_BLOCK_TARGET = 4 * 1024 * 1024     # per-block bytes for the HBM-bound scale kernel
_FUSED_WORK_LIMIT = 2 * 1024 * 1024    # use the single fused kernel below this estimate


def _round_down8(n):
    return max(8, (n // 8) * 8)


def _round_up8(n):
    return ((n + 7) // 8) * 8


def _pyramid_pool_matrix(h, w, ppl):
    """(H*W, f) matrix P so that x_flat @ P reproduces the torch pyramid
    cat([adaptive_avg_pool2d(x, 2**i).view(b,c,1,-1) for i in range(ppl)], -1)
    using the exact adaptive-pool window arithmetic (floor/ceil bounds)."""
    cols = []
    for i in range(ppl):
        s = 2 ** i
        for oi in range(s):
            hs = (oi * h) // s
            he = -((-(oi + 1) * h) // s)
            for oj in range(s):
                ws = (oj * w) // s
                we = -((-(oj + 1) * w) // s)
                m = np.zeros((h, w), np.float32)
                m[hs:he, ws:we] = 1.0 / float((he - hs) * (we - ws))
                cols.append(m.reshape(-1))
    return np.stack(cols, axis=1)  # (H*W, f)


# ----------------------------- kernels --------------------------------------


def _fused_kernel(x_ref, pd_ref, bias_ref, w1l_ref, s_ref, st_ref, w2t_ref,
                  b2c_ref, o_ref):
    # x_ref: (rows, hw)        pd_ref: (hw, d)     bias_ref: (1, d)
    # w1l_ref: (d, rows, m)    s_ref: (b, rows)    st_ref: (rows, b)
    # w2t_ref: (rows, m)       b2c_ref: (rows, 1)  o_ref: (rows, hw)
    des = (jnp.dot(x_ref[...], pd_ref[...], preferred_element_type=jnp.float32)
           + bias_ref[...])                                        # (rows, d)
    # First MLP layer: row r = (bi, ci) uses the W1 block of channel ci, so the
    # weights are pre-tiled host-side to (d, rows, m) and combined on the VPU
    # (tiny: rows*m*d flops, no lane-dim reshapes in-kernel).
    d = pd_ref.shape[1]
    v = des[:, 0:1] * w1l_ref[0]
    for di in range(1, d):
        v = v + des[:, di:di + 1] * w1l_ref[di]                    # (rows, m)
    # Sum channel groups (rows -> batch) and broadcast back using tiny 0/1
    # selection matmuls (avoids any reshape across the lane dimension).
    hmid = jnp.maximum(
        jnp.dot(s_ref[...], v, preferred_element_type=jnp.float32), 0.0)  # (b, m)
    hrep = jnp.dot(st_ref[...], hmid, preferred_element_type=jnp.float32)  # (rows, m)
    z = jnp.sum(hrep * w2t_ref[...], axis=-1, keepdims=True) + b2c_ref[...]
    gate = pl.reciprocal(1.0 + jnp.exp(-z), approx=True)           # sigmoid, EUP recip
    o_ref[...] = (x_ref[...] * gate).astype(o_ref.dtype)


def _pool_des_kernel(x_ref, pd_ref, bias_ref, o_ref):
    # x_ref: (rt, HW)   pd_ref: (HW, d)   bias_ref: (1, d)   o_ref: (rt, d)
    o_ref[...] = (
        jnp.dot(x_ref[...], pd_ref[...], preferred_element_type=jnp.float32)
        + bias_ref[...]
    )


def _mlp_gate_kernel(y_ref, w1_ref, w2_ref, b2_ref, o_ref):
    # y_ref: (b, c*d)  w1_ref: (c*d, m)  w2_ref: (m, c)  b2_ref: (1, c)  o: (b, c)
    h = jnp.dot(y_ref[...], w1_ref[...], preferred_element_type=jnp.float32)
    h = jnp.maximum(h, 0.0)
    z = jnp.dot(h, w2_ref[...], preferred_element_type=jnp.float32) + b2_ref[...]
    o_ref[...] = pl.reciprocal(1.0 + jnp.exp(-z), approx=True)     # sigmoid


def _scale_kernel(x_ref, w_ref, o_ref):
    # x_ref/o_ref: (rt, lt) lane-dense tiles;  w_ref: (rt, 1) per-row gate
    o_ref[...] = (x_ref[...] * w_ref[...]).astype(o_ref.dtype)


# ----------------------------- tiling helpers -------------------------------


def _k1_row_tile(rows, hw, d, xb, budget):
    """VMEM-budget-aware row tile for K1 (x/out double-buffered, pd counted 2x)."""
    fixed = 2 * (hw * d * 4 + d * 4)
    per_row = 2 * (hw * xb + d * 4)
    avail = budget - fixed
    rt = avail // per_row if avail > 0 else 8
    rt = min(int(rt), 512)
    if rt >= rows:
        return rows
    # TODO(synk): for extreme hw (> ~400k elements) even an 8-row block exceeds
    # the budget; a reduction grid axis over hw with a VMEM accumulator would be
    # needed there.
    return _round_down8(rt)


def _k3_tiles(rows, hw, xb, block_target):
    """Lane-dense, budget-aware tiles for the memory-bound scale kernel."""
    lt = hw if hw <= 8192 else 8192            # full extent or multiple of 128
    rt = int(block_target // max(1, lt * xb))
    rt = min(max(8, (rt // 8) * 8), 1024)
    if rt >= rows:
        if lt >= hw and rows > 8:
            # keep >= 2 grid steps so both TensorCores (v7x megacore) get work
            rt = _round_up8(-(-rows // 2))
        else:
            rt = rows
    return rt, lt


# ----------------------------- forward paths --------------------------------


def _fused_forward(x_flat, pd, bias, w1t, w2, b2, *, b, c, d, m, hw):
    rows = b * c
    xb = x_flat.dtype.itemsize
    # Host-side weight re-tilings so the kernel never reshapes across lanes.
    w1l = jnp.transpose(w1t.reshape(c, d, m), (1, 0, 2))            # (d, c, m)
    w1l = jnp.tile(w1l, (1, b, 1))                                  # (d, rows, m)
    s_mat = jnp.repeat(jnp.eye(b, dtype=jnp.float32), c, axis=1)    # (b, rows)
    st_mat = s_mat.T                                                # (rows, b)
    w2til = jnp.tile(w2, (b, 1))                                    # (rows, m)
    b2col = jnp.tile(b2, b).reshape(rows, 1)                        # (rows, 1)

    cost = pl.CostEstimate(
        flops=int(2 * rows * hw * d + 2 * rows * d * m + 4 * b * rows * m
                  + 2 * rows * m + rows * hw),
        transcendentals=int(rows),
        bytes_accessed=int(2 * rows * hw * xb + hw * d * 4
                           + d * rows * m * 4 + rows * m * 4 + rows * 4),
    )
    out_flat = pl.pallas_call(
        _fused_kernel,
        out_shape=jax.ShapeDtypeStruct((rows, hw), x_flat.dtype),
        grid=(1,),
        in_specs=[
            pl.BlockSpec((rows, hw), lambda i: (0, 0)),
            pl.BlockSpec((hw, d), lambda i: (0, 0)),
            pl.BlockSpec((1, d), lambda i: (0, 0)),
            pl.BlockSpec((d, rows, m), lambda i: (0, 0, 0)),
            pl.BlockSpec((b, rows), lambda i: (0, 0)),
            pl.BlockSpec((rows, b), lambda i: (0, 0)),
            pl.BlockSpec((rows, m), lambda i: (0, 0)),
            pl.BlockSpec((rows, 1), lambda i: (0, 0)),
        ],
        out_specs=pl.BlockSpec((rows, hw), lambda i: (0, 0)),
        compiler_params=pltpu.CompilerParams(
            dimension_semantics=("arbitrary",),
            vmem_limit_bytes=_VMEM_LIMIT_BYTES),
        cost_estimate=cost,
    )(x_flat, pd, bias, w1l, s_mat, st_mat, w2til, b2col)
    return out_flat


def _split_forward(x_flat, pd, bias, w1t, w2, b2, *, b, c, d, m, hw):
    rows = b * c
    xb = x_flat.dtype.itemsize
    w2t = w2.T                          # (m, c)
    b2row = b2.reshape(1, c)

    # ---- K1: pyramid pooling + folded des conv -> (rows, d) ----
    rt1 = _k1_row_tile(rows, hw, d, xb, _VMEM_WORK_BUDGET)
    k1_cost = pl.CostEstimate(
        flops=int(2 * rows * hw * d),
        transcendentals=0,
        bytes_accessed=int(rows * hw * xb + hw * d * 4 + rows * d * 4),
    )
    des_out = pl.pallas_call(
        _pool_des_kernel,
        out_shape=jax.ShapeDtypeStruct((rows, d), jnp.float32),
        grid=(pl.cdiv(rows, rt1),),
        in_specs=[
            pl.BlockSpec((rt1, hw), lambda i: (i, 0)),
            pl.BlockSpec((hw, d), lambda i: (0, 0)),
            pl.BlockSpec((1, d), lambda i: (0, 0)),
        ],
        out_specs=pl.BlockSpec((rt1, d), lambda i: (i, 0)),
        compiler_params=pltpu.CompilerParams(
            dimension_semantics=("parallel",),
            vmem_limit_bytes=_VMEM_LIMIT_BYTES),
        cost_estimate=k1_cost,
    )(x_flat, pd, bias)

    # ---- K2: MLP gate -> (b, c) (tiny, single step) ----
    y2 = des_out.reshape(b, c * d)      # free view in HBM
    gate = pl.pallas_call(
        _mlp_gate_kernel,
        out_shape=jax.ShapeDtypeStruct((b, c), jnp.float32),
        grid=(1,),
        in_specs=[
            pl.BlockSpec((b, c * d), lambda i: (0, 0)),
            pl.BlockSpec((c * d, m), lambda i: (0, 0)),
            pl.BlockSpec((m, c), lambda i: (0, 0)),
            pl.BlockSpec((1, c), lambda i: (0, 0)),
        ],
        out_specs=pl.BlockSpec((b, c), lambda i: (0, 0)),
        compiler_params=pltpu.CompilerParams(
            dimension_semantics=("arbitrary",),
            vmem_limit_bytes=_VMEM_LIMIT_BYTES),
    )(y2, w1t, w2t, b2row)

    # ---- K3: channel-wise scaling (HBM-bandwidth-bound) ----
    w_col = gate.reshape(rows, 1)
    rt3, lt3 = _k3_tiles(rows, hw, xb, _K3_BLOCK_TARGET)
    k3_cost = pl.CostEstimate(
        flops=int(rows * hw),
        transcendentals=0,
        bytes_accessed=int(2 * rows * hw * xb + rows * 4),
    )
    out_flat = pl.pallas_call(
        _scale_kernel,
        out_shape=jax.ShapeDtypeStruct((rows, hw), x_flat.dtype),
        grid=(pl.cdiv(rows, rt3), pl.cdiv(hw, lt3)),
        in_specs=[
            pl.BlockSpec((rt3, lt3), lambda i, j: (i, j)),
            pl.BlockSpec((rt3, 1), lambda i, j: (i, 0)),
        ],
        out_specs=pl.BlockSpec((rt3, lt3), lambda i, j: (i, j)),
        compiler_params=pltpu.CompilerParams(
            dimension_semantics=("parallel", "parallel"),
            vmem_limit_bytes=_VMEM_LIMIT_BYTES),
        cost_estimate=k3_cost,
    )(x_flat, w_col)
    return out_flat


def pdl_block_forward(x, des_w, des_b, mlp_w1, mlp_w2, mlp_b2, *, ppl=4,
                      force_path=None):
    """x: (B, C, H, W).  des_w: (d, f, 1, 1), des_b: (d,),
    mlp_w1: (m, c*d), mlp_w2: (c, m), mlp_b2: (c,).
    force_path: None (auto) | "fused" | "split"."""
    b, c, h, w = x.shape
    hw = h * w
    rows = b * c
    xb = x.dtype.itemsize

    # Host-side folding of the fixed pooling operator with the 1x1 `des` conv.
    p_mat = jnp.asarray(_pyramid_pool_matrix(h, w, ppl))            # (HW, f)
    f = p_mat.shape[1]
    if ppl >= 3:
        d = des_w.shape[0]
        pd = p_mat @ des_w.reshape(d, f).T.astype(jnp.float32)      # (HW, d)
        bias = des_b.reshape(1, d).astype(jnp.float32)
    else:
        d = f
        pd = p_mat
        bias = jnp.zeros((1, d), jnp.float32)

    m = mlp_w1.shape[0]
    w1t = mlp_w1.reshape(m, c * d).T.astype(jnp.float32)            # (c*d, m)
    w2 = mlp_w2.reshape(c, m).astype(jnp.float32)                   # (c, m)
    b2 = mlp_b2.reshape(c).astype(jnp.float32)

    x_flat = x.reshape(rows, hw)  # B*C on sublanes, HW lane-dense (free view)

    # ---- path selection: fully-fused single call at small working sets ----
    fused_est = 2 * (2 * rows * hw * xb          # x + out
                     + hw * d * 4                # pd
                     + d * rows * m * 4          # tiled W1
                     + rows * m * 4 + rows * 4   # tiled W2, tiled b2
                     + 2 * b * rows * 4)         # selection matrices
    use_fused = fused_est <= _FUSED_WORK_LIMIT
    if force_path == "fused":
        use_fused = True
    elif force_path == "split":
        use_fused = False

    if use_fused:
        out_flat = _fused_forward(x_flat, pd, bias, w1t, w2, b2,
                                  b=b, c=c, d=d, m=m, hw=hw)
    else:
        out_flat = _split_forward(x_flat, pd, bias, w1t, w2, b2,
                                  b=b, c=c, d=d, m=m, hw=hw)
    return out_flat.reshape(b, c, h, w)


# ------------------------------- demo ---------------------------------------

if __name__ == "__main__":
    def reference(x, des_w, des_b, mlp_w1, mlp_w2, mlp_b2, ppl):
        # Pure-JAX reference of the torch forward (H, W divisible by 2**i).
        b, c, h, w = x.shape
        f = (4 ** ppl - 1) // 3
        d = des_w.shape[0]
        feats = []
        for i in range(ppl):
            s = 2 ** i
            p = x.reshape(b, c, s, h // s, s, w // s).mean(axis=(3, 5))
            feats.append(p.reshape(b, c, s * s))
        y = jnp.concatenate(feats, axis=-1).reshape(b * c, f)
        y = y @ des_w.reshape(d, f).T + des_b
        y = y.reshape(b, c * d)
        hmid = jnp.maximum(y @ mlp_w1.T, 0.0)
        gate = 1.0 / (1.0 + jnp.exp(-(hmid @ mlp_w2.T + mlp_b2)))
        return gate.reshape(b, c, 1, 1) * x

    def run_case(key, B, C, H, W, ppl, force_path):
        F = (4 ** ppl - 1) // 3
        D = min(8, F)
        MF = 16 if C <= 256 else 32
        ks = jax.random.split(key, 6)
        x = jax.random.normal(ks[0], (B, C, H, W), dtype=jnp.float32)
        des_w = 0.1 * jax.random.normal(ks[1], (D, F, 1, 1), dtype=jnp.float32)
        des_b = 0.1 * jax.random.normal(ks[2], (D,), dtype=jnp.float32)
        mlp_w1 = 0.1 * jax.random.normal(ks[3], (MF, D * C), dtype=jnp.float32)
        mlp_w2 = 0.1 * jax.random.normal(ks[4], (C, MF), dtype=jnp.float32)
        mlp_b2 = 0.1 * jax.random.normal(ks[5], (C,), dtype=jnp.float32)
        out = pdl_block_forward(x, des_w, des_b, mlp_w1, mlp_w2, mlp_b2,
                                ppl=ppl, force_path=force_path)
        out = jax.block_until_ready(out)
        ref = reference(x, des_w, des_b, mlp_w1, mlp_w2, mlp_b2, ppl)
        assert out.shape == (B, C, H, W)
        err = float(jnp.max(jnp.abs(out - ref)))
        assert jnp.allclose(out, ref, atol=2e-3, rtol=2e-3), \
            f"mismatch (path={force_path}), max abs err={err}"

    key = jax.random.PRNGKey(0)
    k_a, k_b = jax.random.split(key)
    # small shape -> fully fused single-kernel path (auto-selected)
    run_case(k_a, 2, 4, 16, 16, 4, None)
    # forced K1/K2/K3 split path, exercises cdiv grids with masked edge blocks
    run_case(k_b, 2, 6, 32, 32, 4, "split")

    print("KERNEL_OK")
</pallas_src>

<mosaic_0001>
module attributes {stable_mosaic.version = 11 : i64} {
  func.func @_fused_kernel(%arg0: i32, %arg1: memref<8x256xf32, #tpu.memory_space<vmem>>, %arg2: memref<256x8xf32, #tpu.memory_space<vmem>>, %arg3: memref<1x8xf32, #tpu.memory_space<vmem>>, %arg4: memref<8x8x16xf32, #tpu.memory_space<vmem>>, %arg5: memref<2x8xf32, #tpu.memory_space<vmem>>, %arg6: memref<8x2xf32, #tpu.memory_space<vmem>>, %arg7: memref<8x16xf32, #tpu.memory_space<vmem>>, %arg8: memref<8x1xf32, #tpu.memory_space<vmem>>, %arg9: memref<8x256xf32, #tpu.memory_space<vmem>>) attributes {dimension_semantics = [#tpu.dimension_semantics<arbitrary>], iteration_bounds = array<i64: 1>, scalar_prefetch = 0 : i64, scratch_operands = 0 : i64, tpu.core_type = #tpu.core_type<tc>, window_params = [{pipeline_mode = #tpu.pipeline_mode<synchronous>, transform_indices = @transform_0, window_bounds = array<i64: 8, 256>}, {pipeline_mode = #tpu.pipeline_mode<synchronous>, transform_indices = @transform_1, window_bounds = array<i64: 256, 8>}, {pipeline_mode = #tpu.pipeline_mode<synchronous>, transform_indices = @transform_2, window_bounds = array<i64: 1, 8>}, {pipeline_mode = #tpu.pipeline_mode<synchronous>, transform_indices = @transform_3, window_bounds = array<i64: 8, 8, 16>}, {pipeline_mode = #tpu.pipeline_mode<synchronous>, transform_indices = @transform_4, window_bounds = array<i64: 2, 8>}, {pipeline_mode = #tpu.pipeline_mode<synchronous>, transform_indices = @transform_5, window_bounds = array<i64: 8, 2>}, {pipeline_mode = #tpu.pipeline_mode<synchronous>, transform_indices = @transform_6, window_bounds = array<i64: 8, 16>}, {pipeline_mode = #tpu.pipeline_mode<synchronous>, transform_indices = @transform_7, window_bounds = array<i64: 8, 1>}, {pipeline_mode = #tpu.pipeline_mode<synchronous>, transform_indices = @transform_8, window_bounds = array<i64: 8, 256>}]} {
    %c0 = arith.constant 0 : index
    %c0_0 = arith.constant 0 : index
    %0 = vector.load %arg1[%c0, %c0_0] : memref<8x256xf32, #tpu.memory_space<vmem>>, vector<8x256xf32>
    %c0_1 = arith.constant 0 : index
    %c0_2 = arith.constant 0 : index
    %1 = vector.load %arg2[%c0_1, %c0_2] : memref<256x8xf32, #tpu.memory_space<vmem>>, vector<256x8xf32>
    %cst = arith.constant dense<0.000000e+00> : vector<8x8xf32>
    %2 = tpu.matmul %0, %1, %cst {dimension_numbers = #tpu.dot_dimension_numbers<[1], [0], [0], [1], [0, 0, 1, 1], [], []>} : vector<8x256xf32>, vector<256x8xf32>, vector<8x8xf32> -> vector<8x8xf32>
    %c0_3 = arith.constant 0 : index
    %c0_4 = arith.constant 0 : index
    %3 = vector.load %arg3[%c0_3, %c0_4] : memref<1x8xf32, #tpu.memory_space<vmem>>, vector<1x8xf32>
    %4 = vector.broadcast %3 : vector<1x8xf32> to vector<8x8xf32>
    %5 = arith.addf %2, %4 : vector<8x8xf32>
    %6 = vector.extract_strided_slice %5 {offsets = [0, 0], sizes = [8, 1], strides = [1, 1]} : vector<8x8xf32> to vector<8x1xf32>
    %c0_5 = arith.constant 0 : index
    %c0_6 = arith.constant 0 : index
    %c0_7 = arith.constant 0 : index
    %7 = vector.load %arg4[%c0_5, %c0_6, %c0_7] : memref<8x8x16xf32, #tpu.memory_space<vmem>>, vector<1x8x16xf32>
    %8 = vector.shape_cast %7 : vector<1x8x16xf32> to vector<8x16xf32>
    %9 = vector.broadcast %6 : vector<8x1xf32> to vector<8x16xf32>
    %10 = arith.mulf %9, %8 : vector<8x16xf32>
    %11 = vector.extract_strided_slice %5 {offsets = [0, 1], sizes = [8, 1], strides = [1, 1]} : vector<8x8xf32> to vector<8x1xf32>
    %c1 = arith.constant 1 : index
    %c0_8 = arith.constant 0 : index
    %c0_9 = arith.constant 0 : index
    %12 = vector.load %arg4[%c1, %c0_8, %c0_9] : memref<8x8x16xf32, #tpu.memory_space<vmem>>, vector<1x8x16xf32>
    %13 = vector.shape_cast %12 : vector<1x8x16xf32> to vector<8x16xf32>
    %14 = vector.broadcast %11 : vector<8x1xf32> to vector<8x16xf32>
    %15 = arith.mulf %14, %13 : vector<8x16xf32>
    %16 = arith.addf %10, %15 : vector<8x16xf32>
    %17 = vector.extract_strided_slice %5 {offsets = [0, 2], sizes = [8, 1], strides = [1, 1]} : vector<8x8xf32> to vector<8x1xf32>
    %c2 = arith.constant 2 : index
    %c0_10 = arith.constant 0 : index
    %c0_11 = arith.constant 0 : index
    %18 = vector.load %arg4[%c2, %c0_10, %c0_11] : memref<8x8x16xf32, #tpu.memory_space<vmem>>, vector<1x8x16xf32>
    %19 = vector.shape_cast %18 : vector<1x8x16xf32> to vector<8x16xf32>
    %20 = vector.broadcast %17 : vector<8x1xf32> to vector<8x16xf32>
    %21 = arith.mulf %20, %19 : vector<8x16xf32>
    %22 = arith.addf %16, %21 : vector<8x16xf32>
    %23 = vector.extract_strided_slice %5 {offsets = [0, 3], sizes = [8, 1], strides = [1, 1]} : vector<8x8xf32> to vector<8x1xf32>
    %c3 = arith.constant 3 : index
    %c0_12 = arith.constant 0 : index
    %c0_13 = arith.constant 0 : index
    %24 = vector.load %arg4[%c3, %c0_12, %c0_13] : memref<8x8x16xf32, #tpu.memory_space<vmem>>, vector<1x8x16xf32>
    %25 = vector.shape_cast %24 : vector<1x8x16xf32> to vector<8x16xf32>
    %26 = vector.broadcast %23 : vector<8x1xf32> to vector<8x16xf32>
    %27 = arith.mulf %26, %25 : vector<8x16xf32>
    %28 = arith.addf %22, %27 : vector<8x16xf32>
    %29 = vector.extract_strided_slice %5 {offsets = [0, 4], sizes = [8, 1], strides = [1, 1]} : vector<8x8xf32> to vector<8x1xf32>
    %c4 = arith.constant 4 : index
    %c0_14 = arith.constant 0 : index
    %c0_15 = arith.constant 0 : index
    %30 = vector.load %arg4[%c4, %c0_14, %c0_15] : memref<8x8x16xf32, #tpu.memory_space<vmem>>, vector<1x8x16xf32>
    %31 = vector.shape_cast %30 : vector<1x8x16xf32> to vector<8x16xf32>
    %32 = vector.broadcast %29 : vector<8x1xf32> to vector<8x16xf32>
    %33 = arith.mulf %32, %31 : vector<8x16xf32>
    %34 = arith.addf %28, %33 : vector<8x16xf32>
    %35 = vector.extract_strided_slice %5 {offsets = [0, 5], sizes = [8, 1], strides = [1, 1]} : vector<8x8xf32> to vector<8x1xf32>
    %c5 = arith.constant 5 : index
    %c0_16 = arith.constant 0 : index
    %c0_17 = arith.constant 0 : index
    %36 = vector.load %arg4[%c5, %c0_16, %c0_17] : memref<8x8x16xf32, #tpu.memory_space<vmem>>, vector<1x8x16xf32>
    %37 = vector.shape_cast %36 : vector<1x8x16xf32> to vector<8x16xf32>
    %38 = vector.broadcast %35 : vector<8x1xf32> to vector<8x16xf32>
    %39 = arith.mulf %38, %37 : vector<8x16xf32>
    %40 = arith.addf %34, %39 : vector<8x16xf32>
    %41 = vector.extract_strided_slice %5 {offsets = [0, 6], sizes = [8, 1], strides = [1, 1]} : vector<8x8xf32> to vector<8x1xf32>
    %c6 = arith.constant 6 : index
    %c0_18 = arith.constant 0 : index
    %c0_19 = arith.constant 0 : index
    %42 = vector.load %arg4[%c6, %c0_18, %c0_19] : memref<8x8x16xf32, #tpu.memory_space<vmem>>, vector<1x8x16xf32>
    %43 = vector.shape_cast %42 : vector<1x8x16xf32> to vector<8x16xf32>
    %44 = vector.broadcast %41 : vector<8x1xf32> to vector<8x16xf32>
    %45 = arith.mulf %44, %43 : vector<8x16xf32>
    %46 = arith.addf %40, %45 : vector<8x16xf32>
    %47 = vector.extract_strided_slice %5 {offsets = [0, 7], sizes = [8, 1], strides = [1, 1]} : vector<8x8xf32> to vector<8x1xf32>
    %c7 = arith.constant 7 : index
    %c0_20 = arith.constant 0 : index
    %c0_21 = arith.constant 0 : index
    %48 = vector.load %arg4[%c7, %c0_20, %c0_21] : memref<8x8x16xf32, #tpu.memory_space<vmem>>, vector<1x8x16xf32>
    %49 = vector.shape_cast %48 : vector<1x8x16xf32> to vector<8x16xf32>
    %50 = vector.broadcast %47 : vector<8x1xf32> to vector<8x16xf32>
    %51 = arith.mulf %50, %49 : vector<8x16xf32>
    %52 = arith.addf %46, %51 : vector<8x16xf32>
    %c0_22 = arith.constant 0 : index
    %c0_23 = arith.constant 0 : index
    %53 = vector.load %arg5[%c0_22, %c0_23] : memref<2x8xf32, #tpu.memory_space<vmem>>, vector<2x8xf32>
    %cst_24 = arith.constant dense<0.000000e+00> : vector<2x16xf32>
    %54 = tpu.matmul %53, %52, %cst_24 {dimension_numbers = #tpu.dot_dimension_numbers<[1], [0], [0], [1], [0, 0, 1, 1], [], []>} : vector<2x8xf32>, vector<8x16xf32>, vector<2x16xf32> -> vector<2x16xf32>
    %cst_25 = arith.constant 0.000000e+00 : f32
    %55 = vector.broadcast %cst_25 : f32 to vector<2x16xf32>
    %56 = arith.maximumf %54, %55 : vector<2x16xf32>
    %c0_26 = arith.constant 0 : index
    %c0_27 = arith.constant 0 : index
    %57 = vector.load %arg6[%c0_26, %c0_27] : memref<8x2xf32, #tpu.memory_space<vmem>>, vector<8x2xf32>
    %cst_28 = arith.constant dense<0.000000e+00> : vector<8x16xf32>
    %58 = tpu.matmul %57, %56, %cst_28 {dimension_numbers = #tpu.dot_dimension_numbers<[1], [0], [0], [1], [0, 0, 1, 1], [], []>} : vector<8x2xf32>, vector<2x16xf32>, vector<8x16xf32> -> vector<8x16xf32>
    %c0_29 = arith.constant 0 : index
    %c0_30 = arith.constant 0 : index
    %59 = vector.load %arg7[%c0_29, %c0_30] : memref<8x16xf32, #tpu.memory_space<vmem>>, vector<8x16xf32>
    %60 = arith.mulf %58, %59 : vector<8x16xf32>
    %cst_31 = arith.constant dense<0.000000e+00> : vector<8xf32>
    %61 = vector.multi_reduction <add>, %60, %cst_31 [1] : vector<8x16xf32> to vector<8xf32>
    %62 = vector.shape_cast %61 : vector<8xf32> to vector<8x1xf32>
    %c0_32 = arith.constant 0 : index
    %c0_33 = arith.constant 0 : index
    %63 = vector.load %arg8[%c0_32, %c0_33] : memref<8x1xf32, #tpu.memory_space<vmem>>, vector<8x1xf32>
    %64 = arith.addf %62, %63 : vector<8x1xf32>
    %cst_34 = arith.constant 0.000000e+00 : f32
    %65 = vector.broadcast %cst_34 : f32 to vector<8x1xf32>
    %66 = arith.subf %65, %64 : vector<8x1xf32>
    %67 = math.exp %66 : vector<8x1xf32>
    %cst_35 = arith.constant 1.000000e+00 : f32
    %68 = vector.broadcast %cst_35 : f32 to vector<8x1xf32>
    %69 = arith.addf %68, %67 : vector<8x1xf32>
    %70 = tpu.reciprocal %69 {approx = true} : vector<8x1xf32> -> vector<8x1xf32>
    %c0_36 = arith.constant 0 : index
    %c0_37 = arith.constant 0 : index
    %71 = vector.load %arg1[%c0_36, %c0_37] : memref<8x256xf32, #tpu.memory_space<vmem>>, vector<8x256xf32>
    %72 = vector.broadcast %70 : vector<8x1xf32> to vector<8x256xf32>
    %73 = arith.mulf %71, %72 : vector<8x256xf32>
    %c0_38 = arith.constant 0 : index
    %c0_39 = arith.constant 0 : index
    %74 = vector.load %arg9[%c0_38, %c0_39] : memref<8x256xf32, #tpu.memory_space<vmem>>, vector<8x256xf32>
    tpu.vector_store %arg9[%c0_38, %c0_39], %73 {strides = array<i32>} : memref<8x256xf32, #tpu.memory_space<vmem>>, vector<8x256xf32>,
    return
  }
  func.func @transform_0(%arg0: i32) -> (i32, i32) {
    %c0_i32 = arith.constant 0 : i32
    %c0_i32_0 = arith.constant 0 : i32
    %c0_i32_1 = arith.constant 0 : i32
    return %c0_i32, %c0_i32_0 : i32, i32
  }
  func.func @transform_1(%arg0: i32) -> (i32, i32) {
    %c0_i32 = arith.constant 0 : i32
    %c0_i32_0 = arith.constant 0 : i32
    %c0_i32_1 = arith.constant 0 : i32
    return %c0_i32, %c0_i32_0 : i32, i32
  }
  func.func @transform_2(%arg0: i32) -> (i32, i32) {
    %c0_i32 = arith.constant 0 : i32
    %c0_i32_0 = arith.constant 0 : i32
    %c0_i32_1 = arith.constant 0 : i32
    return %c0_i32, %c0_i32_0 : i32, i32
  }
  func.func @transform_3(%arg0: i32) -> (i32, i32, i32) {
    %c0_i32 = arith.constant 0 : i32
    %c0_i32_0 = arith.constant 0 : i32
    %c0_i32_1 = arith.constant 0 : i32
    %c0_i32_2 = arith.constant 0 : i32
    return %c0_i32, %c0_i32_0, %c0_i32_1 : i32, i32, i32
  }
  func.func @transform_4(%arg0: i32) -> (i32, i32) {
    %c0_i32 = arith.constant 0 : i32
    %c0_i32_0 = arith.constant 0 : i32
    %c0_i32_1 = arith.constant 0 : i32
    return %c0_i32, %c0_i32_0 : i32, i32
  }
  func.func @transform_5(%arg0: i32) -> (i32, i32) {
    %c0_i32 = arith.constant 0 : i32
    %c0_i32_0 = arith.constant 0 : i32
    %c0_i32_1 = arith.constant 0 : i32
    return %c0_i32, %c0_i32_0 : i32, i32
  }
  func.func @transform_6(%arg0: i32) -> (i32, i32) {
    %c0_i32 = arith.constant 0 : i32
    %c0_i32_0 = arith.constant 0 : i32
    %c0_i32_1 = arith.constant 0 : i32
    return %c0_i32, %c0_i32_0 : i32, i32
  }
  func.func @transform_7(%arg0: i32) -> (i32, i32) {
    %c0_i32 = arith.constant 0 : i32
    %c0_i32_0 = arith.constant 0 : i32
    %c0_i32_1 = arith.constant 0 : i32
    return %c0_i32, %c0_i32_0 : i32, i32
  }
  func.func @transform_8(%arg0: i32) -> (i32, i32) {
    %c0_i32 = arith.constant 0 : i32
    %c0_i32_0 = arith.constant 0 : i32
    %c0_i32_1 = arith.constant 0 : i32
    return %c0_i32, %c0_i32_0 : i32, i32
  }
}

</mosaic_0001>

<bundles_post_ra>
// kernel: tpu_custom_call.1
= control target key start
LH: loop header
LB: loop body
LE: loop exit
PB: predicated region body
PF: predicated region fallthrough
CT: control target
= control target key end

     0   :  { %s755_s0 = inlined_call_operand.vmem [shape: f32[8,256], index: 0, kind: input, shape index: {}]   ;;  %s756_s1 = inlined_call_operand.vmem [shape: f32[256,8], index: 1, kind: input, shape index: {}]   ;;  %s757_s2 = inlined_call_operand.vmem [shape: f32[1,8], index: 2, kind: input, shape index: {}]   ;;  %s758_s3 = inlined_call_operand.vmem [shape: f32[8,8,16], index: 3, kind: input, shape index: {}]   ;;  %s759_s4 = inlined_call_operand.vmem [shape: f32[2,8], index: 4, kind: input, shape index: {}]   ;;  %s760_s5 = inlined_call_operand.vmem [shape: f32[8,2], index: 5, kind: input, shape index: {}]   ;;  %s761_s6 = inlined_call_operand.vmem [shape: f32[8,16], index: 6, kind: input, shape index: {}]   ;;  %s762_s7 = inlined_call_operand.vmem [shape: f32[8,1], index: 7, kind: input, shape index: {}]   ;;  %s763_s8 = inlined_call_operand.hbm [shape: f32[8,256], index: 8, kind: output, shape index: {}]  }
   0x1   :  { %v48_v0 = vld [vmem:[%s756_s1 + $0x80] sm:$0xff]  ;;  %v49_v1 = vld [vmem:[%s756_s1 + $0x88] sm:$0xff]  ;;  %v50_v5 = vld [vmem:[%s756_s1 + $0x90] sm:$0xff] }
   0x2   :  { %v32_v2 = vld [vmem:[%s756_s1] sm:$0xff]  ;;  %v455_v3 = vpack.c.bf16 %v49_v1, %v48_v0  ;;  %v33_v4 = vld [vmem:[%s756_s1 + $0x8] sm:$0xff]  ;;  %v51_v6 = vld [vmem:[%s756_s1 + $0x98] sm:$0xff] }
   0x3   :  { %v457_v7 = vpack.c.bf16 %v33_v4, %v32_v2  ;;  %v459_v8 = vpack.c.bf16 %v51_v6, %v50_v5  ;;  %v34_v9 = vld [vmem:[%s756_s1 + $0x10] sm:$0xff]  ;;  %v35_v10 = vld [vmem:[%s756_s1 + $0x18] sm:$0xff]  ;;  %v52_v11 = vld [vmem:[%s756_s1 + $0xa0] sm:$0xff] }
   0x4   :  { %456 = vmatprep.subr.bf16.mxu0 %v455_v3  ;;  %v53_v12 = vld [vmem:[%s756_s1 + $0xa8] sm:$0xff]  ;;  %v461_v13 = vpack.c.bf16 %v35_v10, %v34_v9  ;;  %v36_v15 = vld [vmem:[%s756_s1 + $0x20] sm:$0xff]  ;;  %v54_v17 = vld [vmem:[%s756_s1 + $0xb0] sm:$0xff] }
   0x5   :  { %458 = vmatpush3.bf16.msra.mxu0 %v457_v7  ;;  %v463_v14 = vpack.c.bf16 %v53_v12, %v52_v11  ;;  %v37_v16 = vld [vmem:[%s756_s1 + $0x28] sm:$0xff]  ;;  %v55_v18 = vld [vmem:[%s756_s1 + $0xb8] sm:$0xff]  ;;  %v38_v21 = vld [vmem:[%s756_s1 + $0x30] sm:$0xff] }
   0x6   :  { %460 = vmatprep.subr.bf16.mxu0 %v459_v8  ;;  %v465_v19 = vpack.c.bf16 %v37_v16, %v36_v15  ;;  %v467_v20 = vpack.c.bf16 %v55_v18, %v54_v17  ;;  %v39_v22 = vld [vmem:[%s756_s1 + $0x38] sm:$0xff]  ;;  %v56_v23 = vld [vmem:[%s756_s1 + $0xc0] sm:$0xff]  ;;  %v57_v24 = vld [vmem:[%s756_s1 + $0xc8] sm:$0xff] }
   0x7   :  { %v649_v25 = vld [vmem:[%s755_s0 + $0x8] sm:$0xff] }
   0x8   :  { %135 = vmatprep.mubr.f32.mxu0 %v649_v25 }
   0x9   :  { %462 = vmatpush3.bf16.msra.mxu0 %v461_v13 }
   0xa   :  { %464 = vmatprep.subr.bf16.mxu0 %v463_v14 }
   0xb   :  { %13 = vsyncpa [#allocation3], 0  ;;  %v469_v26 = vpack.c.bf16 %v39_v22, %v38_v21  ;;  %v471_v27 = vpack.c.bf16 %v57_v24, %v56_v23  ;;  %v40_v28 = vld [vmem:[%s756_s1 + $0x40] sm:$0xff]  ;;  %v41_v29 = vld [vmem:[%s756_s1 + $0x48] sm:$0xff]  ;;  %v536_v50 = vmov 2   ;;  %v537_v51 = vmov 0  }
   0xc   :  { %v58_v30 = vld [vmem:[%s756_s1 + $0xd0] sm:$0xff]  ;;  %v59_v31 = vld [vmem:[%s756_s1 + $0xd8] sm:$0xff]  ;;  %v473_v32 = vpack.c.bf16 %v41_v29, %v40_v28  ;;  %v60_v36 = vld [vmem:[%s756_s1 + $0xe0] sm:$0xff]  ;;  %500 = vset.pattern.permute.xlu1 %v536_v50  ;;  %498 = vset.pattern.permute.xlu0 %v537_v51  ;;  %v538_v57 = vmov 3   ;;  %v539_v58 = vmov 1   ;;  %v540_v59 = vmov 4  }
   0xd   :  { %466 = vmatpush3.bf16.msra.mxu0 %v465_v19  ;;  %v475_v33 = vpack.c.bf16 %v59_v31, %v58_v30  ;;  %v42_v34 = vld [vmem:[%s756_s1 + $0x50] sm:$0xff]  ;;  %v43_v35 = vld [vmem:[%s756_s1 + $0x58] sm:$0xff]  ;;  %v61_v37 = vld [vmem:[%s756_s1 + $0xe8] sm:$0xff]  ;;  %v541_v60 = vmov 5   ;;  %v542_v61 = vmov 6   ;;  %v543_v62 = vmov 7  }
   0xe   :  { %468 = vmatprep.subr.bf16.mxu0 %v467_v20  ;;  %v477_v38 = vpack.c.bf16 %v43_v35, %v42_v34  ;;  %v479_v39 = vpack.c.bf16 %v61_v37, %v60_v36  ;;  %v44_v40 = vld [vmem:[%s756_s1 + $0x60] sm:$0xff]  ;;  %v45_v41 = vld [vmem:[%s756_s1 + $0x68] sm:$0xff]  ;;  %v62_v42 = vld [vmem:[%s756_s1 + $0xf0] sm:$0xff]  ;;  %v544_v63 = vmov 0.0   ;;  %vm545_vm0 = vmmov 0  }
   0xf   :  { %v63_v43 = vld [vmem:[%s756_s1 + $0xf8] sm:$0xff]  ;;  %v481_v44 = vpack.c.bf16 %v45_v41, %v44_v40  ;;  %v46_v46 = vld [vmem:[%s756_s1 + $0x70] sm:$0xff]  ;;  %v697_v49 = vld [vmem:[%s755_s0] sm:$0xff]  ;;  %445 = vmatprep.subr.mxu1 %v544_v63  ;;  %447 = vmatprep.mubr.msk.f32.mxu1 %vm545_vm0, %v544_v63  ;;  %vm205_vm1 = vcmask 64512   ;;  %vm285_vm2 = vcmask 1041408   ;;  %vm281_vm3 = vcmask 15360  }
  0x10   :  { %v483_v45 = vpack.c.bf16 %v63_v43, %v62_v42  ;;  %v47_v47 = vld [vmem:[%s756_s1 + $0x78] sm:$0xff]  ;;  %v395_v53 = vld [vmem:[%s757_s2] ss:$0 sm:$0xff]  ;;  %v396_v3 = vld [vmem:[%s758_s3 + $0x8] sm:$0xff]  ;;  %vm361_vm4 = vcmask 130048  }
  0x11   :  { %470 = vmatpush3.bf16.msra.mxu0 %v469_v26  ;;  %v485_v48 = vpack.c.bf16 %v47_v47, %v46_v46  ;;  %v141_v2 = vld [vmem:[%s758_s3] sm:$0xff]  ;;  %v397_v4 = vld [vmem:[%s758_s3 + $0x10] sm:$0xff]  ;;  %v398_v9 = vld [vmem:[%s758_s3 + $0x18] sm:$0xff] }
  0x12   :  { %472 = vmatprep.subr.bf16.mxu0 %v471_v27  ;;  %v399_v12 = vld [vmem:[%s758_s3 + $0x20] sm:$0xff]  ;;  %v400_v18 = vld [vmem:[%s758_s3 + $0x28] sm:$0xff]  ;;  %v401_v21 = vld [vmem:[%s758_s3 + $0x30] sm:$0xff] }
  0x13   :  { %v402_v27 = vld [vmem:[%s758_s3 + $0x38] sm:$0xff]  ;;  %v280_v36 = vld [vmem:[%s760_s5] sm:$0xff]  ;;  %s546_s5 = smov [#allocation2]  }
  0x14   :  { %v359_v37 = vld [vmem:[%s761_s6] sm:$0xff]  ;;  %s387_s6 = sshll.u32 %s546_s5, 4  ;;  %s388_s6 = int_to_ptr.vmem [resolvable:$true] %s387_s6 }
  0x15   :  { %474 = vmatpush3.bf16.msra.mxu0 %v473_v32  ;;  %v204_v32 = vld [vmem:[%s759_s4] sm:$0x3]  ;;  %p517_p1 = scmp.lt.s32.totalorder %s388_s6, %s388_s6 }
  0x16   :  { %476 = vmatprep.subr.bf16.mxu0 %v475_v33  ;;  %v365_v42 = vld [vmem:[%s762_s7] sm:$0xff]  ;;  %s512_s7 = scalar_lea.vmem %s388_s6, 256 }
  0x17   :  { %p513_p0 = scmp.ne.s32.totalorder %s388_s6, %s512_s7  ;;  %p518_p2 = scmp.lt.s32.totalorder %s512_s7, %s512_s7 }
  0x19   :  { %478 = vmatpush3.bf16.msra.mxu0 %v477_v38  ;;  %p519_p3 = por %p518_p2, %p517_p1 }
  0x1a   :  { %480 = vmatprep.subr.bf16.mxu0 %v479_v39 }
  0x1b   :  { %p520_p4 = pnand %p519_p3, %p513_p0 }
  0x1d   :  { %482 = vmatpush3.bf16.msra.mxu0 %v481_v44 }
  0x1e   :  { %484 = vmatprep.subr.bf16.mxu0 %v483_v45 }
  0x21   :  { %486 = vmatpush3.bf16.msra.mxu0 %v485_v48 }
  0x24   :  { %136 = vmatmul.mubr.f32.vlgmr.msra.gmra.mrb[0].mxu0 %v697_v49 }
  0xf7   :  { %v438_v52 = vpop.f32.mrb[0].mxu0 }
  0xf8   :  { %v439_v54 = vpop.f32.mrb[1].mxu0 }
  0xf9   :  { %v440_v55 = vadd.f32 %v439_v54, %v438_v52 }
  0xfb   :  { %v138_v56 = vadd.f32 %v440_v55, %v395_v53 }
  0xfd   :  { %159 = vperm.xlu1 %500, %v138_v56   ;;  %144 = vperm.xlu0 %498, %v138_v56  }
 0x101   :  { %501 = vset.pattern.permute.xlu1 %v538_v57  ;;  %499 = vset.pattern.permute.xlu0 %v539_v58 }
 0x102   :  { %167 = vperm.xlu1 %501, %v138_v56   ;;  %151 = vperm.xlu0 %499, %v138_v56  }
 0x106   :  { %502 = vset.pattern.permute.xlu1 %v540_v59  ;;  %503 = vset.pattern.permute.xlu0 %v541_v60 }
 0x107   :  { %175 = vperm.xlu1 %502, %v138_v56   ;;  %183 = vperm.xlu0 %503, %v138_v56  }
 0x10b   :  { %504 = vset.pattern.permute.xlu1 %v542_v61  ;;  %507 = vset.pattern.permute.xlu0 %v537_v51 }
 0x10c   :  { %191 = vperm.xlu1 %504, %v138_v56  }
 0x110   :  { %505 = vset.pattern.permute.xlu1 %v543_v62 }
 0x111   :  { %199 = vperm.xlu1 %505, %v138_v56  }
 0x115   :  { %506 = vset.pattern.permute.xlu1 %v537_v51 }
 0x17c   :  { %v160_v0 = vpop.permute.xlu1 %159  ;;  %v145_v1 = vpop.permute.xlu0 %144 }
 0x17d   :  { %v147_v7 = vmul.f32 %v145_v1, %v141_v2  ;;  %v162_v10 = vmul.f32 %v397_v4, %v160_v0 }
 0x181   :  { %v168_v5 = vpop.permute.xlu1 %167  ;;  %v152_v6 = vpop.permute.xlu0 %151 }
 0x182   :  { %v154_v8 = vmul.f32 %v396_v3, %v152_v6  ;;  %v170_v13 = vmul.f32 %v398_v9, %v168_v5 }
 0x184   :  { %v155_v11 = vadd.f32 %v154_v8, %v147_v7 }
 0x186   :  { %v163_v14 = vadd.f32 %v162_v10, %v155_v11  ;;  %v176_v15 = vpop.permute.xlu1 %175  ;;  %v184_v19 = vpop.permute.xlu0 %183 }
 0x187   :  { %v178_v16 = vmul.f32 %v399_v12, %v176_v15  ;;  %v186_v22 = vmul.f32 %v400_v18, %v184_v19 }
 0x188   :  { %v171_v17 = vadd.f32 %v170_v13, %v163_v14 }
 0x18a   :  { %v179_v20 = vadd.f32 %v178_v16, %v171_v17 }
 0x18b   :  { %v192_v23 = vpop.permute.xlu1 %191 }
 0x18c   :  { %v187_v24 = vadd.f32 %v186_v22, %v179_v20  ;;  %v194_v26 = vmul.f32 %v401_v21, %v192_v23 }
 0x18e   :  { %v195_v29 = vadd.f32 %v194_v26, %v187_v24 }
 0x190   :  { %v200_v28 = vpop.permute.xlu1 %199 }
 0x191   :  { %v202_v30 = vmul.f32 %v402_v27, %v200_v28 }
 0x193   :  { %v203_v31 = vadd.f32 %v202_v30, %v195_v29 }
 0x195   :  { %446 = vmatpush3.msra.mxu1 %v203_v31 }
 0x196   :  { %448 = vmatmul.mubr.msk.f32.vlgmr.msra.gmra.mrb[0].mxu1 %vm205_vm1, %v204_v32  ;;  %450 = vmatprep.subr.mxu1 %v544_v63 }
 0x197   :  { %452 = vmatprep.mubr.msk.f32.mxu1 %vm545_vm0, %v544_v63 }
 0x269   :  { %v275_v33 = vpop.f32.mrb[0].mxu1 }
 0x26a   :  { %v279_v34 = vmax.f32 %v275_v33, 0.0  ;;  %v449_v35 = vpop.f32.mrb[1].mxu1 }
 0x26c   :  { %451 = vmatpush3.msk.msra.mxu1 %vm285_vm2, %v279_v34 }
 0x26d   :  { %453 = vmatmul.mubr.msk.f32.vlgmr.msra.gmra.mrb[2].mxu1 %vm281_vm3, %v280_v36 }
 0x340   :  { %v355_v38 = vpop.f32.mrb[2].mxu1 }
 0x341   :  { %v360_v39 = vmul.f32 %v359_v37, %v355_v38  ;;  %v454_v40 = vpop.f32.mrb[3].mxu1 }
 0x343   :  { %v362_v41 = vsel %vm361_vm4, %v360_v39, 0.0 }
 0x344   :  { %363 = vadd.xlane.f32.xlu0 %v362_v41 }
 0x3d1   :  { %v364_v43 = vpop.xlane.xlu0 %363 }
 0x3d2   :  { %v366_v44 = vadd.f32 %v365_v42, %v364_v43 }
 0x3d4   :  { %v367_v45 = vsub.f32 0.0, %v366_v44 }
 0x3d6   :  { %v368_v46 = vmul.f32 1.442695, %v367_v45 }
 0x3d8   :  { %508 = vpow2.f32 %v368_v46 }
 0x3e2   :  { %v509_v47 = vpop.eup %508 }
 0x3e3   :  { %v370_v48 = vadd.f32 1.0, %v509_v47 }
 0x3e5   :  { %510 = vrcp.f32 %v370_v48 }
 0x3ef   :  { %v511_v50 = vpop.eup %510 }
 0x3f0   :  { %374 = vperm.xlu1 %506, %v511_v50  }
 0x46f   :  { %v375_v51 = vpop.permute.xlu1 %374 }
 0x470   :  { %v377_v52 = vmul.f32 %v375_v51, %v697_v49  ;;  %v378_v53 = vmul.f32 %v375_v51, %v649_v25 }
 0x472   :  { %379 = vst [vmem:[#allocation2] sm:$0xff] %v377_v52  ;;  %380 = vst [vmem:[#allocation2 + $0x8] sm:$0xff] %v378_v53 }
 0x473   :  { %523 = shalt.err (!%p520_p4)
}
 0x474   :  { %s524_s30 = scalar_lea.hbm %s763_s8, 256 }
 0x475   :  { %p525_p5 = scmp.ne.s32.totalorder %s763_s8, %s524_s30  ;;  %p528_p6 = scmp.lt.u32.totalorder %s524_s30, %s763_s8 }
 0x477   :  { %p530_p7 = pnand %p528_p6, %p525_p5 }
 0x479   :  { %533 = shalt.err (!%p530_p7)
}
 0x47a   :  { %390 = dma.vmem_to_hbm [thread:$0]  %s388_s6, 256, %s763_s8, [#allocation3]  }
 0x47b   :  { %534 = dma.done.wait [#allocation3], 256  }
 0x47c   :  { %535 = vsyncadd [#allocation3], 4294967040 }
 0x47d   :  { %394 = vsyncpa [#allocation3], 1 }

</bundles_post_ra>
